<compile_context>
chip_gen: v5e
topology: v5e:2x2
jax: 0.10.0
libtpu: 0.0.40
codegen_flags: <defaults>
</compile_context>

<pallas_src>
import functools

import jax
import jax.numpy as jnp
from jax.experimental import pallas as pl
from jax.experimental.pallas import tpu as pltpu


_NEG_BIG = -1e30  # bias fill for padded logit columns -> exp() underflows to 0


def _round_up(x, m):
    return ((x + m - 1) // m) * m


def _choose_tb(B):
    """Batch tile: multiple of 16 sublanes (bf16-friendly), minimal batch padding,
    >= 2 grid steps (v7x dual TensorCore) when B is large enough, capped at 512."""
    if B <= 32:
        return _round_up(B, 16)
    half = min(512, _round_up(-(-B // 2), 16))
    cands = {half, 128, 256, 512}

    def cost(tb):
        b_pad = _round_up(B, tb)
        steps = -(-B // tb)
        return (b_pad - B,                   # minimize wasted (padded) rows
                0 if steps >= 2 else 1,      # prefer >=2 grid steps (v7x dual TC)
                tb)                          # then the smaller tile (VMEM headroom)

    return min(cands, key=cost)


def _softmax_store(logits, probs_ref):
    # Numerically-stable softmax in f32 on the VPU; padded (-1e30-biased) columns
    # exp() to exactly 0, so in-bounds rows sum to 1. Exact reciprocal on a (TB, 1)
    # column is essentially free (review: avoid approx rcp so row sums stay at 1).
    m = jnp.max(logits, axis=-1, keepdims=True)
    e = jnp.exp(logits - m)
    denom = jnp.sum(e, axis=-1, keepdims=True)
    probs_ref[...] = (e * pl.reciprocal(denom, approx=False)).astype(probs_ref.dtype)


def _predictor_kernel(x_ref, w1_ref, b1_ref, w2_ref, b2_ref, logits_ref, probs_ref):
    # x arrives as f32 from HBM; bf16 cast happens here on the VPU (no wrapper copy).
    x = x_ref[...].astype(jnp.bfloat16)
    # Hidden layer: bf16 MXU matmul with f32 accumulate; bias + ReLU in f32 (VPU).
    h = jnp.dot(x, w1_ref[...], preferred_element_type=jnp.float32)
    h = jnp.maximum(h + b1_ref[...], 0.0)
    # Categorical head (bf16 MXU matmul, f32 accumulate).
    logits = jnp.dot(h.astype(jnp.bfloat16), w2_ref[...],
                     preferred_element_type=jnp.float32)
    logits = logits + b2_ref[...]            # padded cols carry -1e30 from the bias
    logits_ref[...] = logits
    _softmax_store(logits, probs_ref)


def _dist_only_kernel(x_ref, w2_ref, b2_ref, logits_ref, probs_ref):
    # hidden_size == -1 path: Categorical head directly on x (no ReLU).
    x = x_ref[...].astype(jnp.bfloat16)
    logits = jnp.dot(x, w2_ref[...], preferred_element_type=jnp.float32)
    logits = logits + b2_ref[...]
    logits_ref[...] = logits
    _softmax_store(logits, probs_ref)


@functools.partial(jax.jit, static_argnames=("num_instances",))
def instance_predictor_forward(x, params, *, num_instances):
    """InstancePredictor forward.

    x:      (B, D) f32 -- passed to the kernel unpadded (bf16 cast happens in-kernel).
    params: output of prepare_params(): padded bf16 weights + padded f32 biases.
    Returns (logits, probs), each (B, num_instances) f32.
    """
    w1p, b1p, w2p, b2p = params
    B, D = x.shape
    C_pad = w2p.shape[1]
    has_hidden = w1p is not None
    f32, bf16 = jnp.float32, jnp.bfloat16

    TB = _choose_tb(B)
    grid = (pl.cdiv(B, TB),)

    x_spec = pl.BlockSpec((TB, D), lambda i: (i, 0))
    out_spec = pl.BlockSpec((TB, C_pad), lambda i: (i, 0))
    resident = lambda a: pl.BlockSpec(a.shape, lambda i: (0, 0))  # VMEM-resident

    out_shape = (jax.ShapeDtypeStruct((B, C_pad), f32),    # logits
                 jax.ShapeDtypeStruct((B, C_pad), bf16))   # probs (bf16 halves traffic)

    if has_hidden:
        ins = (x, w1p, b1p, w2p, b2p)
        in_specs = [x_spec, resident(w1p), resident(b1p), resident(w2p), resident(b2p)]
        kernel = _predictor_kernel
        H_pad = w1p.shape[1]
        flops = 2 * B * (D * H_pad + H_pad * C_pad)
        h_bytes = TB * H_pad * 4
    else:
        ins = (x, w2p, b2p)
        in_specs = [x_spec, resident(w2p), resident(b2p)]
        kernel = _dist_only_kernel
        flops = 2 * B * D * C_pad
        h_bytes = 0

    w_bytes = sum(int(a.size) * a.dtype.itemsize for a in ins[1:])
    io_bytes = int(x.size) * 4 + B * C_pad * (4 + 2)

    # Conservative VMEM budget: double-buffered I/O tiles + resident weights + h.
    vmem_est = 2 * (TB * D * 4 + TB * C_pad * (4 + 2)) + w_bytes + h_bytes
    vmem_limit = int(min(max(2 * vmem_est, 32 << 20), 48 << 20))
    # TODO(synk): for very large hidden/num_instances (multi-thousand) the fully
    # VMEM-resident weights no longer fit (especially v7x's 64 MiB VMEM); add a
    # K/N grid axis with pl.when-gated accumulation instead of raising the limit.

    cost = pl.CostEstimate(flops=flops,
                           transcendentals=B * C_pad,
                           bytes_accessed=w_bytes + io_bytes)

    logits_p, probs_p = pl.pallas_call(
        kernel,
        out_shape=out_shape,
        grid=grid,
        in_specs=in_specs,
        out_specs=(out_spec, out_spec),
        compiler_params=pltpu.CompilerParams(
            dimension_semantics=("parallel",),
            vmem_limit_bytes=vmem_limit),
        cost_estimate=cost,
    )(*ins)

    logits = logits_p[:, :num_instances]
    probs = probs_p[:, :num_instances].astype(f32)
    return logits, probs


def prepare_params(w_hidden, b_hidden, w_dist, b_dist):
    """One-time (per weight update) padding + bf16 cast, hoisted out of the jitted
    per-call forward path. Feature dims are padded to 128 lanes; padded logit
    columns get a -1e30 bias so the in-kernel softmax ignores them."""
    f32, bf16 = jnp.float32, jnp.bfloat16
    K, C = w_dist.shape
    C_pad = _round_up(C, 128)
    if w_hidden is not None:
        D, H = w_hidden.shape
        H_pad = _round_up(H, 128)
        w1p = jnp.zeros((D, H_pad), bf16).at[:, :H].set(w_hidden.astype(bf16))
        b1p = jnp.zeros((1, H_pad), f32).at[0, :H].set(
            jnp.reshape(b_hidden, (-1,)).astype(f32))
        k_pad = H_pad
    else:
        w1p, b1p = None, None
        k_pad = K                      # contraction dim = D; x is fed unpadded
    w2p = jnp.zeros((k_pad, C_pad), bf16).at[:K, :C].set(w_dist.astype(bf16))
    b2p = jnp.full((1, C_pad), _NEG_BIG, f32).at[0, :C].set(
        jnp.reshape(b_dist, (-1,)).astype(f32))
    return w1p, b1p, w2p, b2p


def _orthogonal(key, shape, gain):
    """Deterministic orthogonal init (matches nn.init.orthogonal_ semantics)."""
    rows, cols = shape
    n = max(rows, cols)
    a = jax.random.normal(key, (n, n), dtype=jnp.float32)
    q, r = jnp.linalg.qr(a)
    q = q * jnp.sign(jnp.diag(r))
    return gain * q[:rows, :cols]


def make_params(key, input_size, hidden_size, num_instances):
    """Raw f32 parameters matching the PyTorch init (orthogonal weights, zero bias).
    Linear weights are stored pre-transposed as (in, out) so kernels compute x @ W^T."""
    k1, k2 = jax.random.split(key)
    relu_gain = 2.0 ** 0.5
    if hidden_size == -1:
        w_hidden, b_hidden = None, None
        dist_in = input_size
    else:
        w_hidden = _orthogonal(k1, (hidden_size, input_size), relu_gain).T
        b_hidden = jnp.zeros((1, hidden_size), jnp.float32)
        dist_in = hidden_size
    w_dist = _orthogonal(k2, (num_instances, dist_in), 0.01).T
    b_dist = jnp.zeros((1, num_instances), jnp.float32)
    return w_hidden, b_hidden, w_dist, b_dist


def _reference(x, w_hidden, b_hidden, w_dist, b_dist):
    """Pure-JAX reference with the same bf16-matmul / f32-elementwise recipe."""
    bf16, f32 = jnp.bfloat16, jnp.float32
    h = x.astype(bf16)
    if w_hidden is not None:
        h = jnp.dot(h, w_hidden.astype(bf16), preferred_element_type=f32)
        h = jnp.maximum(h + b_hidden, 0.0).astype(bf16)
    logits = jnp.dot(h, w_dist.astype(bf16), preferred_element_type=f32) + b_dist
    return logits, jax.nn.softmax(logits, axis=-1)


if __name__ == "__main__":
    key = jax.random.PRNGKey(0)
    kx, kp, kp2 = jax.random.split(key, 3)

    batch = 16
    input_size = 32
    hidden_size = 32
    num_instances = 16

    x = jax.random.normal(kx, (batch, input_size), dtype=jnp.float32)

    # --- hidden-layer path -------------------------------------------------
    raw = make_params(kp, input_size, hidden_size, num_instances)
    params = prepare_params(*raw)          # one-time pad + bf16 cast (hoisted)
    logits, probs = instance_predictor_forward(x, params, num_instances=num_instances)
    jax.block_until_ready((logits, probs))

    logits_ref, probs_ref = _reference(x, *raw)
    assert logits.shape == (batch, num_instances)
    assert probs.shape == (batch, num_instances)
    assert jnp.allclose(logits, logits_ref, atol=1e-3, rtol=1e-3)
    assert jnp.allclose(probs, probs_ref, atol=5e-3)        # probs emitted as bf16
    assert jnp.allclose(jnp.sum(probs, axis=-1), 1.0, atol=1e-2)

    # --- hidden_size == -1 path (no hidden layer / no ReLU) -----------------
    raw2 = make_params(kp2, input_size, -1, num_instances)
    params2 = prepare_params(*raw2)
    logits2, probs2 = instance_predictor_forward(x, params2, num_instances=num_instances)
    jax.block_until_ready((logits2, probs2))

    logits2_ref, probs2_ref = _reference(x, *raw2)
    assert jnp.allclose(logits2, logits2_ref, atol=1e-3, rtol=1e-3)
    assert jnp.allclose(probs2, probs2_ref, atol=5e-3)
    assert jnp.allclose(jnp.sum(probs2, axis=-1), 1.0, atol=1e-2)

    # TODO(synk): Categorical sampling / log_prob / entropy and the sklearn
    # classification_report / accuracy helpers are host-side utilities, not kernel work.
    print("KERNEL_OK")
</pallas_src>

<mosaic_0001>
module attributes {stable_mosaic.version = 11 : i64} {
  func.func @_predictor_kernel(%arg0: i32, %arg1: memref<16x32xf32, #tpu.memory_space<vmem>>, %arg2: memref<32x128xbf16, #tpu.memory_space<vmem>>, %arg3: memref<1x128xf32, #tpu.memory_space<vmem>>, %arg4: memref<128x128xbf16, #tpu.memory_space<vmem>>, %arg5: memref<1x128xf32, #tpu.memory_space<vmem>>, %arg6: memref<16x128xf32, #tpu.memory_space<vmem>>, %arg7: memref<16x128xbf16, #tpu.memory_space<vmem>>) attributes {dimension_semantics = [#tpu.dimension_semantics<parallel>], iteration_bounds = array<i64: 1>, scalar_prefetch = 0 : i64, scratch_operands = 0 : i64, tpu.core_type = #tpu.core_type<tc>, window_params = [{transform_indices = @transform_0, window_bounds = array<i64: 16, 32>}, {pipeline_mode = #tpu.pipeline_mode<synchronous>, transform_indices = @transform_1, window_bounds = array<i64: 32, 128>}, {pipeline_mode = #tpu.pipeline_mode<synchronous>, transform_indices = @transform_2, window_bounds = array<i64: 1, 128>}, {pipeline_mode = #tpu.pipeline_mode<synchronous>, transform_indices = @transform_3, window_bounds = array<i64: 128, 128>}, {pipeline_mode = #tpu.pipeline_mode<synchronous>, transform_indices = @transform_4, window_bounds = array<i64: 1, 128>}, {transform_indices = @transform_5, window_bounds = array<i64: 16, 128>}, {transform_indices = @transform_6, window_bounds = array<i64: 16, 128>}]} {
    %c0 = arith.constant 0 : index
    %c0_0 = arith.constant 0 : index
    %0 = vector.load %arg1[%c0, %c0_0] : memref<16x32xf32, #tpu.memory_space<vmem>>, vector<16x32xf32>
    %1 = arith.truncf %0 : vector<16x32xf32> to vector<16x32xbf16>
    %c0_1 = arith.constant 0 : index
    %c0_2 = arith.constant 0 : index
    %2 = vector.load %arg2[%c0_1, %c0_2] : memref<32x128xbf16, #tpu.memory_space<vmem>>, vector<32x128xbf16>
    %cst = arith.constant dense<0.000000e+00> : vector<16x128xf32>
    %3 = tpu.matmul %1, %2, %cst {dimension_numbers = #tpu.dot_dimension_numbers<[1], [0], [0], [1], [0, 0, 1, 1], [], []>} : vector<16x32xbf16>, vector<32x128xbf16>, vector<16x128xf32> -> vector<16x128xf32>
    %c0_3 = arith.constant 0 : index
    %c0_4 = arith.constant 0 : index
    %4 = vector.load %arg3[%c0_3, %c0_4] : memref<1x128xf32, #tpu.memory_space<vmem>>, vector<1x128xf32>
    %5 = vector.broadcast %4 : vector<1x128xf32> to vector<16x128xf32>
    %6 = arith.addf %3, %5 : vector<16x128xf32>
    %cst_5 = arith.constant 0.000000e+00 : f32
    %7 = vector.broadcast %cst_5 : f32 to vector<16x128xf32>
    %8 = arith.maximumf %6, %7 : vector<16x128xf32>
    %9 = arith.truncf %8 : vector<16x128xf32> to vector<16x128xbf16>
    %c0_6 = arith.constant 0 : index
    %c0_7 = arith.constant 0 : index
    %10 = vector.load %arg4[%c0_6, %c0_7] : memref<128x128xbf16, #tpu.memory_space<vmem>>, vector<128x128xbf16>
    %cst_8 = arith.constant dense<0.000000e+00> : vector<16x128xf32>
    %11 = tpu.matmul %9, %10, %cst_8 {dimension_numbers = #tpu.dot_dimension_numbers<[1], [0], [0], [1], [0, 0, 1, 1], [], []>} : vector<16x128xbf16>, vector<128x128xbf16>, vector<16x128xf32> -> vector<16x128xf32>
    %c0_9 = arith.constant 0 : index
    %c0_10 = arith.constant 0 : index
    %12 = vector.load %arg5[%c0_9, %c0_10] : memref<1x128xf32, #tpu.memory_space<vmem>>, vector<1x128xf32>
    %13 = vector.broadcast %12 : vector<1x128xf32> to vector<16x128xf32>
    %14 = arith.addf %11, %13 : vector<16x128xf32>
    %c0_11 = arith.constant 0 : index
    %c0_12 = arith.constant 0 : index
    %15 = vector.load %arg6[%c0_11, %c0_12] : memref<16x128xf32, #tpu.memory_space<vmem>>, vector<16x128xf32>
    tpu.vector_store %arg6[%c0_11, %c0_12], %14 {strides = array<i32>} : memref<16x128xf32, #tpu.memory_space<vmem>>, vector<16x128xf32>,
    %cst_13 = arith.constant dense<0xFF800000> : vector<16xf32>
    %16 = vector.multi_reduction <maximumf>, %14, %cst_13 [1] : vector<16x128xf32> to vector<16xf32>
    %17 = vector.shape_cast %16 : vector<16xf32> to vector<16x1xf32>
    %18 = vector.broadcast %17 : vector<16x1xf32> to vector<16x128xf32>
    %19 = arith.subf %14, %18 : vector<16x128xf32>
    %20 = math.exp %19 : vector<16x128xf32>
    %cst_14 = arith.constant dense<0.000000e+00> : vector<16xf32>
    %21 = vector.multi_reduction <add>, %20, %cst_14 [1] : vector<16x128xf32> to vector<16xf32>
    %22 = vector.shape_cast %21 : vector<16xf32> to vector<16x1xf32>
    %23 = tpu.reciprocal %22 : vector<16x1xf32> -> vector<16x1xf32>
    %24 = vector.broadcast %23 : vector<16x1xf32> to vector<16x128xf32>
    %25 = arith.mulf %20, %24 : vector<16x128xf32>
    %26 = arith.truncf %25 : vector<16x128xf32> to vector<16x128xbf16>
    %c0_15 = arith.constant 0 : index
    %c0_16 = arith.constant 0 : index
    %27 = vector.load %arg7[%c0_15, %c0_16] : memref<16x128xbf16, #tpu.memory_space<vmem>>, vector<16x128xbf16>
    tpu.vector_store %arg7[%c0_15, %c0_16], %26 {strides = array<i32>} : memref<16x128xbf16, #tpu.memory_space<vmem>>, vector<16x128xbf16>,
    return
  }
  func.func @transform_0(%arg0: i32) -> (i32, i32) {
    %c0_i32 = arith.constant 0 : i32
    %c0_i32_0 = arith.constant 0 : i32
    return %arg0, %c0_i32 : i32, i32
  }
  func.func @transform_1(%arg0: i32) -> (i32, i32) {
    %c0_i32 = arith.constant 0 : i32
    %c0_i32_0 = arith.constant 0 : i32
    %c0_i32_1 = arith.constant 0 : i32
    return %c0_i32, %c0_i32_0 : i32, i32
  }
  func.func @transform_2(%arg0: i32) -> (i32, i32) {
    %c0_i32 = arith.constant 0 : i32
    %c0_i32_0 = arith.constant 0 : i32
    %c0_i32_1 = arith.constant 0 : i32
    return %c0_i32, %c0_i32_0 : i32, i32
  }
  func.func @transform_3(%arg0: i32) -> (i32, i32) {
    %c0_i32 = arith.constant 0 : i32
    %c0_i32_0 = arith.constant 0 : i32
    %c0_i32_1 = arith.constant 0 : i32
    return %c0_i32, %c0_i32_0 : i32, i32
  }
  func.func @transform_4(%arg0: i32) -> (i32, i32) {
    %c0_i32 = arith.constant 0 : i32
    %c0_i32_0 = arith.constant 0 : i32
    %c0_i32_1 = arith.constant 0 : i32
    return %c0_i32, %c0_i32_0 : i32, i32
  }
  func.func @transform_5(%arg0: i32) -> (i32, i32) {
    %c0_i32 = arith.constant 0 : i32
    %c0_i32_0 = arith.constant 0 : i32
    return %arg0, %c0_i32 : i32, i32
  }
  func.func @transform_6(%arg0: i32) -> (i32, i32) {
    %c0_i32 = arith.constant 0 : i32
    %c0_i32_0 = arith.constant 0 : i32
    return %arg0, %c0_i32 : i32, i32
  }
}

</mosaic_0001>

<bundles_post_ra>
// kernel: instance_predictor_forward.1
= control target key start
LH: loop header
LB: loop body
LE: loop exit
PB: predicated region body
PF: predicated region fallthrough
CT: control target
= control target key end

     0   :  { %12 = vsyncpa [#allocation3], 0  ;;  %s517_s0 = inlined_call_operand.hbm [shape: f32[16,32], index: 0, kind: input, shape index: {}]   ;;  %s518_s1 = inlined_call_operand.hbm [shape: bf16[32,128], index: 1, kind: input, shape index: {}]   ;;  %s519_s2 = inlined_call_operand.vmem [shape: f32[1,128], index: 2, kind: input, shape index: {}]   ;;  %s520_s3 = inlined_call_operand.hbm [shape: bf16[128,128], index: 3, kind: input, shape index: {}]   ;;  %s521_s4 = inlined_call_operand.vmem [shape: f32[1,128], index: 4, kind: input, shape index: {}]   ;;  %s522_s5 = inlined_call_operand.hbm [shape: f32[16,128], index: 5, kind: output, shape index: {0}]   ;;  %s523_s6 = inlined_call_operand.vmem [shape: bf16[16,128], index: 6, kind: output, shape index: {1}]  }
   0x1   :  { %13 = vsyncpa [#allocation6], 0  ;;  %s32_s23 = sshll.u32 %s518_s1, 4  ;;  %s33_s23 = int_to_ptr.hbm [resolvable:$true] %s32_s23 }
   0x2   :  { %14 = vsyncpa [#allocation4], 0  ;;  %s447_s24 = smov [#allocation5]   ;;  %s19_s28 = sshll.u32 %s517_s0, 4  ;;  %s20_s28 = int_to_ptr.hbm [resolvable:$true] %s19_s28 }
   0x3   :  { %s34_s25 = sshll.u32 %s447_s24, 4  ;;  %s448_s29 = smov 64   ;;  %s35_s25 = int_to_ptr.vmem [resolvable:$true] %s34_s25 }
   0x4   :  { %s449_s30 = smov 4   ;;  %s450_s7 = smov [#allocation2]  }
   0x5   :  { %40 = dma.hbm_to_vmem [thread:$0]  %s33_s23, 256, %s35_s25, [#allocation6], %s448_s29, %s448_s29, %s449_s30  }
   0x6   :  { %s21_s8 = sshll.u32 %s450_s7, 4  ;;  %s451_s9 = smov 128   ;;  %s22_s8 = int_to_ptr.vmem [resolvable:$true] %s21_s8 }
   0x7   :  { %s452_s10 = smov 8   ;;  %s47_s12 = sshll.u32 %s520_s3, 4  ;;  %s48_s12 = int_to_ptr.hbm [resolvable:$true] %s47_s12 }
   0x8   :  { %27 = dma.hbm_to_vmem [thread:$0]  %s20_s28, 256, %s22_s8, [#allocation3], %s451_s9, %s451_s9, %s452_s10  }
   0x9   :  { %s453_s13 = smov [#allocation7]  }
   0xa   :  { %s49_s0 = sshll.u32 %s453_s13, 4  ;;  %s50_s0 = int_to_ptr.vmem [resolvable:$true] %s49_s0 }
   0xb   :  { %55 = dma.hbm_to_vmem [thread:$0]  %s48_s12, 1024, %s50_s0, [#allocation6], %s448_s29, %s448_s29, %s449_s30  }
   0xc   :  { %441 = dma.done.wait [#allocation3], 256  }
   0xd   :  { %442 = vsyncadd [#allocation3], 4294967040 }
   0xe   :  { %443 = dma.done.wait [#allocation6], 1280  }
   0xf   :  { %444 = vsyncadd [#allocation6], 4294966016  ;;  %v313_v0 = vld [vmem:[#allocation5 + $0x8] sm:$0xff]  ;;  %v312_v1 = vld [vmem:[#allocation5] sm:$0xff]  ;;  %vm94_vm0 = vcmask 261120   ;;  %s253_s19 = sshll.u32 %s522_s5, 4  ;;  %s254_s19 = int_to_ptr.hbm [resolvable:$true] %s253_s19 }
  0x10   :  { %v321_v2 = vld [vmem:[#allocation7 + $0x38] sm:$0xff]  ;;  %104 = vmatpush.bf16.msra.mxu0 %v313_v0  ;;  %v71_v3 = vld [vmem:[#allocation2] sm:$0xff]  ;;  %v72_v4 = vld [vmem:[#allocation2 + $0x8] sm:$0xff] }
  0x11   :  { %183 = vmatpush.bf16.msra.mxu1 %v321_v2  ;;  %v320_v5 = vld [vmem:[#allocation7 + $0x30] sm:$0xff]  ;;  %v73_v6 = vpack.c.bf16 %v72_v4, %v71_v3  ;;  %v319_v7 = vld [vmem:[#allocation7 + $0x28] sm:$0xff]  ;;  %v318_v8 = vld [vmem:[#allocation7 + $0x20] sm:$0xff] }
  0x12   :  { %v317_v9 = vld [vmem:[#allocation7 + $0x18] sm:$0xff]  ;;  %v316_v10 = vld [vmem:[#allocation7 + $0x10] sm:$0xff]  ;;  %v315_v11 = vld [vmem:[#allocation7 + $0x8] sm:$0xff] }
  0x13   :  { %v314_v12 = vld [vmem:[#allocation7] sm:$0xff] }
  0x14   :  { %105 = vmatpush.bf16.msra.mxu0 %v312_v1  ;;  %v335_v14 = vld [vmem:[%s519_s2] ss:$0 sm:$0xff]  ;;  %s454_s2 = smov [#allocation8]  }
  0x15   :  { %184 = vmatpush.bf16.msra.mxu1 %v320_v5  ;;  %v336_v21 = vld [vmem:[%s521_s4] ss:$0 sm:$0xff]  ;;  %s251_s4 = sshll.u32 %s454_s2, 4  ;;  %s252_s4 = int_to_ptr.vmem [resolvable:$true] %s251_s4 }
  0x17   :  { %279 = vmatmul.msk.bf16.vlgmr.msra.gmra.mxu0 %vm94_vm0, %v73_v6 }
  0x19   :  { %185 = vmatpush.bf16.msra.mxu1 %v319_v7 }
  0x1d   :  { %186 = vmatpush.bf16.msra.mxu1 %v318_v8 }
  0x21   :  { %187 = vmatpush.bf16.msra.mxu1 %v317_v9 }
  0x25   :  { %188 = vmatpush.bf16.msra.mxu1 %v316_v10 }
  0x29   :  { %189 = vmatpush.bf16.msra.mxu1 %v315_v11 }
  0x2d   :  { %190 = vmatpush.bf16.msra.mxu1 %v314_v12 }
  0x94   :  { %v107_v13 = vpop.f32.mrf.mxu0 }
  0x95   :  { %v108_v15 = vadd.f32 %v335_v14, %v107_v13 }
  0x97   :  { %v112_v18 = vmax.f32 %v108_v15, 0.0 }
  0x9c   :  { %v109_v16 = vpop.f32.mrf.mxu0 }
  0x9d   :  { %v110_v17 = vadd.f32 %v335_v14, %v109_v16 }
  0x9f   :  { %v113_v19 = vmax.f32 %v110_v17, 0.0 }
  0xa1   :  { %v114_v20 = vpack.c.bf16 %v113_v19, %v112_v18 }
  0xa3   :  { %191 = vmatmul.bf16.vlgmr.msra.gmra.mxu1 %v114_v20 }
 0x120   :  { %v192_v22 = vpop.f32.mrf.mxu1 }
 0x121   :  { %v193_v23 = vadd.f32 %v336_v21, %v192_v22 }
 0x123   :  { %197 = vst [vmem:[#allocation8] sm:$0xff] %v193_v23  ;;  %199 = vmax.xlane.f32.xlu0 %v193_v23 }
 0x128   :  { %v194_v24 = vpop.f32.mrf.mxu1 }
 0x129   :  { %v195_v25 = vadd.f32 %v336_v21, %v194_v24 }
 0x12b   :  { %198 = vst [vmem:[#allocation8 + $0x8] sm:$0xff] %v195_v25  ;;  %201 = vmax.xlane.f32.xlu0 %v195_v25 }
 0x12c   :  { %259 = dma.vmem_to_hbm [thread:$0]  %s252_s4, 256, %s254_s19, [#allocation4], %s451_s9, %s451_s9, %s452_s10  }
 0x196   :  { %v200_v26 = vpop.xlane.xlu0 %199 }
 0x197   :  { %v203_v27 = vsub.f32 %v193_v23, %v200_v26 }
 0x199   :  { %v205_v28 = vmul.f32 1.442695, %v203_v27 }
 0x19b   :  { %337 = vpow2.f32 %v205_v28 }
 0x19e   :  { %v202_v29 = vpop.xlane.xlu0 %201 }
 0x19f   :  { %v204_v30 = vsub.f32 %v195_v25, %v202_v29 }
 0x1a1   :  { %v338_v31 = vpop.eup %337  ;;  %v207_v32 = vmul.f32 1.442695, %v204_v30 }
 0x1a2   :  { %209 = vadd.xlane.f32.xlu1 %v338_v31 }
 0x1a3   :  { %339 = vpow2.f32 %v207_v32 }
 0x1a9   :  { %v340_v33 = vpop.eup %339 }
 0x1aa   :  { %211 = vadd.xlane.f32.xlu1 %v340_v33 }
 0x215   :  { %v210_v34 = vpop.xlane.xlu1 %209 }
 0x216   :  { %341 = vrcp.f32 %v210_v34  ;;  %v224_v43 = vand.u32 2147483648, %v210_v34  ;;  %vm218_vm2 = vweird.f32 %v210_v34  ;;  %v222_v44 = vand.u32 2147483647, %v210_v34 }
 0x218   :  { %v225_v50 = vor.u32 1.1754944e-38, %v224_v43  ;;  %vm223_vm5 = vcmp.eq.f32.partialorder %v222_v44, 8.507059e+37 }
 0x21c   :  { %v342_v35 = vpop.eup %341 }
 0x21d   :  { %v214_v36 = vmul.f32 %v342_v35, %v210_v34  ;;  %v212_v37 = vpop.xlane.xlu1 %211  ;;  %vm219_vm1 = vweird.f32 %v342_v35 }
 0x21e   :  { %343 = vrcp.f32 %v212_v37  ;;  %vm220_vm3 = vmor %vm218_vm2, %vm219_vm1  ;;  %v238_v46 = vand.u32 2147483648, %v212_v37  ;;  %v236_v49 = vand.u32 2147483647, %v212_v37  ;;  %vm232_vm6 = vweird.f32 %v212_v37 }
 0x21f   :  { %v215_v38 = vsub.f32 1.0, %v214_v36 }
 0x220   :  { %v239_v53 = vor.u32 1.1754944e-38, %v238_v46  ;;  %vm237_vm8 = vcmp.eq.f32.partialorder %v236_v49, 8.507059e+37 }
 0x221   :  { %v216_v39 = vmul.f32 %v342_v35, %v215_v38 }
 0x223   :  { %v217_v41 = vadd.f32 %v342_v35, %v216_v39 }
 0x224   :  { %v344_v40 = vpop.eup %343 }
 0x225   :  { %v228_v42 = vmul.f32 %v344_v40, %v212_v37  ;;  %v221_v47 = vsel %vm220_vm3, %v342_v35, %v217_v41  ;;  %vm233_vm4 = vweird.f32 %v344_v40 }
 0x226   :  { %v226_v52 = vsel %vm223_vm5, %v225_v50, %v221_v47  ;;  %vm234_vm7 = vmor %vm232_vm6, %vm233_vm4 }
 0x227   :  { %v229_v45 = vsub.f32 1.0, %v228_v42  ;;  %v241_v56 = vmul.f32 %v338_v31, %v226_v52 }
 0x229   :  { %v230_v48 = vmul.f32 %v344_v40, %v229_v45 }
 0x22b   :  { %v231_v51 = vadd.f32 %v344_v40, %v230_v48 }
 0x22d   :  { %v235_v54 = vsel %vm234_vm7, %v344_v40, %v231_v51 }
 0x22e   :  { %v240_v55 = vsel %vm237_vm8, %v239_v53, %v235_v54 }
 0x22f   :  { %v242_v57 = vmul.f32 %v340_v33, %v240_v55 }
 0x231   :  { %v325_v58 = vpack.c.bf16 %v242_v57, %v241_v56 }
 0x233   :  { %326 = vst [vmem:[%s523_s6] sm:$0xff] %v325_v58  }
 0x234   :  { %445 = dma.done.wait [#allocation4], 256  }
 0x235   :  { %446 = vsyncadd [#allocation4], 4294967040 }
 0x236   :  { %268 = vsyncpa [#allocation3], 1 }
 0x237   :  { %269 = vsyncpa [#allocation6], 1 }
 0x238   :  { %270 = vsyncpa [#allocation4], 1 }

</bundles_post_ra>
